<compile_context>
chip_gen: v7x
topology: tpu7x:2x2x1
jax: 0.10.0
libtpu: 0.0.40
codegen_flags: <defaults>
</compile_context>

<pallas_src>
import functools

import jax
import jax.numpy as jnp
from jax import lax
from jax.experimental import pallas as pl
from jax.experimental.pallas import tpu as pltpu


# ----------------------------- tiling helpers --------------------------------
def _round_up(x, m):
    return ((x + m - 1) // m) * m


def _vmem_capacity_bytes():
    try:
        return int(pltpu.get_tpu_info().vmem_capacity_bytes)
    except Exception:
        return 64 * 1024 * 1024          # conservative fallback (v7x per-TC VMEM)


def _choose_tiles(B, L, N, C, D_out):
    """Pick (TB batch slabs, TN node lanes, vmem_limit) vs a gen-aware budget."""
    cap = _vmem_capacity_bytes()
    vmem_limit = int(min(cap * 3 // 4, cap - (8 << 20)))
    budget = int(cap * 0.35)
    isz = 4                              # f32

    def block_bytes(tb, tn):
        tm = tn * C
        lp, dp = _round_up(L, 8), _round_up(D_out, 8)
        tmp, tnp = _round_up(tm, 128), _round_up(tn, 128)
        x_b = 2 * tb * lp * tmp * isz           # double-buffered input slabs
        o_b = 2 * tb * dp * tnp * isz           # double-buffered output slabs
        s_b = 2 * tmp * tnp * isz               # group-sum matrix (grid resident)
        w_b = 2 * C * dp * _round_up(L, 128) * isz
        aff = 2 * 2 * dp * tnp * isz            # scale + shift blocks
        return x_b + o_b + s_b + w_b + aff

    # Node tile: full N if it fits the budget, else a lane-aligned multiple of 128.
    if block_bytes(1, N) <= budget:
        tn = N
    else:
        tn = max((N // 128) * 128, 128)
        while tn > 128 and block_bytes(1, tn) > budget:
            tn -= 128
    node_tiles = -(-N // tn)

    # Batch tile: biggest that fits (capped to bound in-kernel unrolling).
    tb = 1
    for cand in range(min(B, 16), 0, -1):
        if block_bytes(cand, tn) <= budget:
            tb = cand
            break

    # Guarantee >= 2 grid steps when possible so both v7x TensorCores get work.
    if node_tiles == 1 and B >= 2:
        tb = min(tb, max(-(-B // 2), 1))

    return tb, tn, vmem_limit


# ----------------------------- Pallas kernel ----------------------------------
def _lr_hypermin_kernel(x_ref, w_ref, s_ref, scale_ref, shift_ref, o_ref, *,
                        n_ch, tb, lanes_total):
    # x_ref:     (TB, L, TM)     input slabs; lanes = merged (node, channel) axis
    # w_ref:     (C, D_out, L)   per-input-channel fc1 weight slices (resident)
    # s_ref:     (TM, TN)        0/1 node group-sum + stride-C lane compaction
    # scale_ref: (D_out, TN)     gamma            (ones when affine=False)
    # shift_ref: (D_out, TN)     b*gamma + beta   (just b when affine=False)
    # o_ref:     (TB, D_out, TN) final per-node outputs
    tm = x_ref.shape[2]
    lane = lax.broadcasted_iota(jnp.int32, (1, tm), 1)
    cid = lane % n_ch                                    # lane -> input channel
    if lanes_total % tm != 0:                            # last node tile may pad
        valid = (pl.program_id(0) * tm + lane) < lanes_total
    else:
        valid = None

    s = s_ref[...]
    scale = scale_ref[...]
    shift = shift_ref[...]

    for t in range(tb):                                  # static unrolled slabs
        x_t = x_ref[t]                                   # (L, TM)
        if valid is not None:
            x_t = jnp.where(valid, x_t, 0.0)             # keep NaN garbage out
        z = None
        for c in range(n_ch):
            xc = jnp.where(cid == c, x_t, 0.0)           # mask small operand
            zc = jnp.dot(w_ref[c], xc, preferred_element_type=jnp.float32)
            z = zc if z is None else z + zc              # (D_out, TM)
        # Node-sum + compaction + bias + affine, all fused in VMEM.
        y = jnp.dot(z, s, preferred_element_type=jnp.float32)   # (D_out, TN)
        o_ref[t] = (y * scale + shift).astype(o_ref.dtype)


def lr_hypermin_pallas(x3, w_stack, s_sum, scale, shift, *, tb, tn, vmem_limit):
    """x3: (B, L, N*C) -> fused outputs (B, D_out, N)."""
    B, L, M = x3.shape
    C, D_out, _ = w_stack.shape
    TM = tn * C
    grid = (-(-M // TM), -(-B // tb))    # node tiles OUTERMOST -> W/S/affine resident
    kernel = functools.partial(_lr_hypermin_kernel, n_ch=C, tb=tb, lanes_total=M)
    return pl.pallas_call(
        kernel,
        out_shape=jax.ShapeDtypeStruct((B, D_out, M // C), x3.dtype),
        grid_spec=pltpu.PrefetchScalarGridSpec(
            num_scalar_prefetch=0,
            grid=grid,
            in_specs=[
                pl.BlockSpec((tb, L, TM), lambda j, b: (b, 0, j)),
                pl.BlockSpec((C, D_out, L), lambda j, b: (0, 0, 0)),
                pl.BlockSpec((TM, tn), lambda j, b: (0, 0)),
                pl.BlockSpec((D_out, tn), lambda j, b: (0, j)),
                pl.BlockSpec((D_out, tn), lambda j, b: (0, j)),
            ],
            out_specs=pl.BlockSpec((tb, D_out, tn), lambda j, b: (b, 0, j)),
        ),
        compiler_params=pltpu.CompilerParams(
            dimension_semantics=("parallel", "parallel"),
            vmem_limit_bytes=vmem_limit),
    )(x3, w_stack, s_sum, scale, shift)


# ----------------------------- Parameters -------------------------------------
def init_params(key, history_seq_len, prediction_seq_len, num_nodes,
                input_dim, output_dim, affine=True):
    L, C = history_seq_len, input_dim
    L_pred, C_out = prediction_seq_len, output_dim
    d_in, d_out = L * C, L_pred * C_out
    kw, kb = jax.random.split(key)
    bound = 1.0 / jnp.sqrt(float(d_in))          # PyTorch nn.Linear default init
    w = jax.random.uniform(kw, (d_in, d_out), jnp.float32, -bound, bound)
    b = jax.random.uniform(kb, (d_out,), jnp.float32, -bound, bound)
    gamma = jnp.ones((L_pred, num_nodes, C_out), jnp.float32)
    beta = jnp.zeros((L_pred, num_nodes, C_out), jnp.float32)
    # Pre-flattened copies for the kernel path, built ONCE at init:
    #   w_stack[c, d, l] = w[l*C + c, d];  gamma_t/beta_t[d, n], d = p*C_out + q.
    w_stack = jnp.transpose(w.reshape(L, C, d_out), (1, 2, 0))
    gamma_t = jnp.transpose(gamma, (0, 2, 1)).reshape(d_out, num_nodes)
    beta_t = jnp.transpose(beta, (0, 2, 1)).reshape(d_out, num_nodes)
    return dict(w=w, b=b, gamma=gamma, beta=beta,
                w_stack=w_stack, gamma_t=gamma_t, beta_t=beta_t,
                affine=affine, L_pred=L_pred, C_out=C_out)


# ----------------------------- Forward wrapper ---------------------------------
@functools.partial(jax.jit, static_argnames=("L_pred", "C_out", "affine"))
def _forward_impl(long_history_data, w_stack, b, gamma_t, beta_t,
                  *, L_pred, C_out, affine):
    B, L, N, C = long_history_data.shape
    D_out = L_pred * C_out

    # Free reshape (merges contiguous minor dims) — no transpose pre-pass.
    x3 = long_history_data.reshape(B, L, N * C)

    tb, tn, vmem_limit = _choose_tiles(B, L, N, C, D_out)
    TM = tn * C

    # Constant 0/1 matrix: per-node channel sum AND stride-C lane compaction in
    # one MXU op inside the kernel.  Tile-invariant, DMA'd once per core.
    s_sum = (jnp.arange(TM, dtype=jnp.int32)[:, None] // C
             == jnp.arange(tn, dtype=jnp.int32)[None, :]).astype(x3.dtype)

    # Fused fc1-bias + HyperMin affine:  (raw + b)*gamma + beta == raw*scale + shift
    if affine:
        scale = gamma_t
        shift = b[:, None] * gamma_t + beta_t
    else:
        scale = jnp.ones((D_out, N), x3.dtype)
        shift = jnp.broadcast_to(b[:, None], (D_out, N))

    y = lr_hypermin_pallas(x3, w_stack, s_sum, scale, shift,
                           tb=tb, tn=tn, vmem_limit=vmem_limit)   # (B, D_out, N)

    # Layout-only epilogue on the C_in-times-smaller output tensor.
    y = y.reshape(B, L_pred, C_out, N)
    return jnp.transpose(y, (0, 1, 3, 2))                        # (B, L_pred, N, C_out)


def lr_hypermin_forward(params, history_data, long_history_data, future_data,
                        epoch=0, batch_seen=0, train=False):
    # history_data / future_data / epoch / batch_seen / train are unused by the
    # reference forward pass (kept for signature parity).
    del history_data, future_data, epoch, batch_seen, train
    return _forward_impl(long_history_data, params["w_stack"], params["b"],
                         params["gamma_t"], params["beta_t"],
                         L_pred=params["L_pred"], C_out=params["C_out"],
                         affine=params["affine"])


def lr_hypermin_reference(params, long_history_data):
    B, L, N, C = long_history_data.shape
    L_pred, C_out = params["L_pred"], params["C_out"]
    x = jnp.transpose(long_history_data, (0, 2, 1, 3)).reshape(B, N, L * C)
    y = x @ params["w"] + params["b"]
    y = y.reshape(B, N, L_pred, C_out)
    y = jnp.transpose(y, (0, 2, 1, 3))
    if params["affine"]:
        y = y * params["gamma"][None] + params["beta"][None]
    return y


# --------------------------------- Main ----------------------------------------
if __name__ == "__main__":
    B = 2
    history_seq_len = 12
    prediction_seq_len = 12
    num_nodes = 8
    input_dim = 3
    output_dim = 1

    key = jax.random.PRNGKey(0)
    kp, k1, k2, k3 = jax.random.split(key, 4)

    params = init_params(kp, history_seq_len, prediction_seq_len, num_nodes,
                         input_dim, output_dim, affine=True)

    history_data = jax.random.normal(
        k1, (B, history_seq_len, num_nodes, input_dim), jnp.float32)
    long_history_data = jax.random.normal(
        k2, (B, history_seq_len, num_nodes, input_dim), jnp.float32)
    future_data = jax.random.normal(
        k3, (B, prediction_seq_len, num_nodes, output_dim), jnp.float32)

    out = lr_hypermin_forward(params, history_data, long_history_data,
                              future_data, epoch=0, batch_seen=0, train=False)
    out = jax.block_until_ready(out)

    ref = lr_hypermin_reference(params, long_history_data)
    assert out.shape == (B, prediction_seq_len, num_nodes, output_dim), out.shape
    assert jnp.allclose(out, ref, atol=1e-4, rtol=1e-4), "mismatch vs reference"

    print("KERNEL_OK")
</pallas_src>

<mosaic_0001>
module attributes {stable_mosaic.version = 11 : i64} {
  func.func @_lr_hypermin_kernel(%arg0: i32, %arg1: i32, %arg2: memref<1x12x24xf32, #tpu.memory_space<vmem>>, %arg3: memref<3x12x12xf32, #tpu.memory_space<vmem>>, %arg4: memref<24x8xf32, #tpu.memory_space<vmem>>, %arg5: memref<12x8xf32, #tpu.memory_space<vmem>>, %arg6: memref<12x8xf32, #tpu.memory_space<vmem>>, %arg7: memref<1x12x8xf32, #tpu.memory_space<vmem>>) attributes {dimension_semantics = [#tpu.dimension_semantics<parallel>, #tpu.dimension_semantics<parallel>], iteration_bounds = array<i64: 1, 2>, scalar_prefetch = 0 : i64, scratch_operands = 0 : i64, tpu.core_type = #tpu.core_type<tc>, window_params = [{transform_indices = @transform_0, window_bounds = array<i64: 1, 12, 24>}, {pipeline_mode = #tpu.pipeline_mode<synchronous>, transform_indices = @transform_1, window_bounds = array<i64: 3, 12, 12>}, {pipeline_mode = #tpu.pipeline_mode<synchronous>, transform_indices = @transform_2, window_bounds = array<i64: 24, 8>}, {transform_indices = @transform_3, window_bounds = array<i64: 12, 8>}, {transform_indices = @transform_4, window_bounds = array<i64: 12, 8>}, {transform_indices = @transform_5, window_bounds = array<i64: 1, 12, 8>}]} {
    %0 = tpu.iota {dimensions = array<i32: 1>} : vector<1x24xi32>
    %c3_i32 = arith.constant 3 : i32
    %c0_i32 = arith.constant 0 : i32
    %1 = arith.cmpi eq, %c3_i32, %c0_i32 : i32
    %c1_i32 = arith.constant 1 : i32
    %2 = arith.select %1, %c1_i32, %c3_i32 : i32
    %3 = vector.broadcast %2 : i32 to vector<1x24xi32>
    %4 = arith.remsi %0, %3 : vector<1x24xi32>
    %c0_i32_0 = arith.constant 0 : i32
    %5 = vector.broadcast %c0_i32_0 : i32 to vector<1x24xi32>
    %6 = arith.cmpi ne, %4, %5 : vector<1x24xi32>
    %c0_i32_1 = arith.constant 0 : i32
    %7 = vector.broadcast %c0_i32_1 : i32 to vector<1x24xi32>
    %8 = arith.cmpi slt, %4, %7 : vector<1x24xi32>
    %c0_i32_2 = arith.constant 0 : i32
    %9 = arith.cmpi slt, %2, %c0_i32_2 : i32
    %10 = vector.broadcast %9 : i1 to vector<1x24xi1>
    %11 = vector.broadcast %10 : vector<1x24xi1> to vector<1x24xi1>
    %12 = arith.xori %8, %11 : vector<1x24xi1>
    %13 = arith.andi %12, %6 : vector<1x24xi1>
    %14 = vector.broadcast %2 : i32 to vector<1x24xi32>
    %15 = arith.addi %4, %14 : vector<1x24xi32>
    %16 = arith.select %13, %15, %4 : vector<1x24xi1>, vector<1x24xi32>
    %c0 = arith.constant 0 : index
    %c0_3 = arith.constant 0 : index
    %17 = vector.load %arg4[%c0, %c0_3] : memref<24x8xf32, #tpu.memory_space<vmem>>, vector<24x8xf32>
    %c0_4 = arith.constant 0 : index
    %c0_5 = arith.constant 0 : index
    %18 = vector.load %arg5[%c0_4, %c0_5] : memref<12x8xf32, #tpu.memory_space<vmem>>, vector<12x8xf32>
    %c0_6 = arith.constant 0 : index
    %c0_7 = arith.constant 0 : index
    %19 = vector.load %arg6[%c0_6, %c0_7] : memref<12x8xf32, #tpu.memory_space<vmem>>, vector<12x8xf32>
    %c0_8 = arith.constant 0 : index
    %c0_9 = arith.constant 0 : index
    %c0_10 = arith.constant 0 : index
    %20 = vector.load %arg2[%c0_8, %c0_9, %c0_10] : memref<1x12x24xf32, #tpu.memory_space<vmem>>, vector<1x12x24xf32>
    %21 = vector.shape_cast %20 : vector<1x12x24xf32> to vector<12x24xf32>
    %c0_i32_11 = arith.constant 0 : i32
    %22 = vector.broadcast %c0_i32_11 : i32 to vector<1x24xi32>
    %23 = arith.cmpi eq, %16, %22 : vector<1x24xi32>
    %cst = arith.constant 0.000000e+00 : f32
    %24 = vector.shape_cast %23 : vector<1x24xi1> to vector<1x24xi1>
    %25 = vector.broadcast %24 : vector<1x24xi1> to vector<12x24xi1>
    %26 = vector.broadcast %cst : f32 to vector<12x24xf32>
    %27 = arith.select %25, %21, %26 : vector<12x24xi1>, vector<12x24xf32>
    %c0_12 = arith.constant 0 : index
    %c0_13 = arith.constant 0 : index
    %c0_14 = arith.constant 0 : index
    %28 = vector.load %arg3[%c0_12, %c0_13, %c0_14] : memref<3x12x12xf32, #tpu.memory_space<vmem>>, vector<1x12x12xf32>
    %29 = vector.shape_cast %28 : vector<1x12x12xf32> to vector<12x12xf32>
    %cst_15 = arith.constant dense<0.000000e+00> : vector<12x24xf32>
    %30 = tpu.matmul %29, %27, %cst_15 {dimension_numbers = #tpu.dot_dimension_numbers<[1], [0], [0], [1], [0, 0, 1, 1], [], []>} : vector<12x12xf32>, vector<12x24xf32>, vector<12x24xf32> -> vector<12x24xf32>
    %c1_i32_16 = arith.constant 1 : i32
    %31 = vector.broadcast %c1_i32_16 : i32 to vector<1x24xi32>
    %32 = arith.cmpi eq, %16, %31 : vector<1x24xi32>
    %cst_17 = arith.constant 0.000000e+00 : f32
    %33 = vector.shape_cast %32 : vector<1x24xi1> to vector<1x24xi1>
    %34 = vector.broadcast %33 : vector<1x24xi1> to vector<12x24xi1>
    %35 = vector.broadcast %cst_17 : f32 to vector<12x24xf32>
    %36 = arith.select %34, %21, %35 : vector<12x24xi1>, vector<12x24xf32>
    %c1 = arith.constant 1 : index
    %c0_18 = arith.constant 0 : index
    %c0_19 = arith.constant 0 : index
    %37 = vector.load %arg3[%c1, %c0_18, %c0_19] : memref<3x12x12xf32, #tpu.memory_space<vmem>>, vector<1x12x12xf32>
    %38 = vector.shape_cast %37 : vector<1x12x12xf32> to vector<12x12xf32>
    %cst_20 = arith.constant dense<0.000000e+00> : vector<12x24xf32>
    %39 = tpu.matmul %38, %36, %cst_20 {dimension_numbers = #tpu.dot_dimension_numbers<[1], [0], [0], [1], [0, 0, 1, 1], [], []>} : vector<12x12xf32>, vector<12x24xf32>, vector<12x24xf32> -> vector<12x24xf32>
    %40 = arith.addf %30, %39 : vector<12x24xf32>
    %c2_i32 = arith.constant 2 : i32
    %41 = vector.broadcast %c2_i32 : i32 to vector<1x24xi32>
    %42 = arith.cmpi eq, %16, %41 : vector<1x24xi32>
    %cst_21 = arith.constant 0.000000e+00 : f32
    %43 = vector.shape_cast %42 : vector<1x24xi1> to vector<1x24xi1>
    %44 = vector.broadcast %43 : vector<1x24xi1> to vector<12x24xi1>
    %45 = vector.broadcast %cst_21 : f32 to vector<12x24xf32>
    %46 = arith.select %44, %21, %45 : vector<12x24xi1>, vector<12x24xf32>
    %c2 = arith.constant 2 : index
    %c0_22 = arith.constant 0 : index
    %c0_23 = arith.constant 0 : index
    %47 = vector.load %arg3[%c2, %c0_22, %c0_23] : memref<3x12x12xf32, #tpu.memory_space<vmem>>, vector<1x12x12xf32>
    %48 = vector.shape_cast %47 : vector<1x12x12xf32> to vector<12x12xf32>
    %cst_24 = arith.constant dense<0.000000e+00> : vector<12x24xf32>
    %49 = tpu.matmul %48, %46, %cst_24 {dimension_numbers = #tpu.dot_dimension_numbers<[1], [0], [0], [1], [0, 0, 1, 1], [], []>} : vector<12x12xf32>, vector<12x24xf32>, vector<12x24xf32> -> vector<12x24xf32>
    %50 = arith.addf %40, %49 : vector<12x24xf32>
    %cst_25 = arith.constant dense<0.000000e+00> : vector<12x8xf32>
    %51 = tpu.matmul %50, %17, %cst_25 {dimension_numbers = #tpu.dot_dimension_numbers<[1], [0], [0], [1], [0, 0, 1, 1], [], []>} : vector<12x24xf32>, vector<24x8xf32>, vector<12x8xf32> -> vector<12x8xf32>
    %52 = arith.mulf %51, %18 : vector<12x8xf32>
    %53 = arith.addf %52, %19 : vector<12x8xf32>
    %c0_26 = arith.constant 0 : index
    %c0_27 = arith.constant 0 : index
    %c0_28 = arith.constant 0 : index
    %54 = vector.load %arg7[%c0_26, %c0_27, %c0_28] : memref<1x12x8xf32, #tpu.memory_space<vmem>>, vector<1x12x8xf32>
    %55 = vector.shape_cast %54 : vector<1x12x8xf32> to vector<12x8xf32>
    %56 = vector.shape_cast %53 : vector<12x8xf32> to vector<1x12x8xf32>
    tpu.vector_store %arg7[%c0_26, %c0_27, %c0_28], %56 {strides = array<i32>} : memref<1x12x8xf32, #tpu.memory_space<vmem>>, vector<1x12x8xf32>,
    return
  }
  func.func @transform_0(%arg0: i32, %arg1: i32) -> (i32, i32, i32) {
    %c0_i32 = arith.constant 0 : i32
    %c0_i32_0 = arith.constant 0 : i32
    return %arg1, %c0_i32, %arg0 : i32, i32, i32
  }
  func.func @transform_1(%arg0: i32, %arg1: i32) -> (i32, i32, i32) {
    %c0_i32 = arith.constant 0 : i32
    %c0_i32_0 = arith.constant 0 : i32
    %c0_i32_1 = arith.constant 0 : i32
    %c0_i32_2 = arith.constant 0 : i32
    return %c0_i32, %c0_i32_0, %c0_i32_1 : i32, i32, i32
  }
  func.func @transform_2(%arg0: i32, %arg1: i32) -> (i32, i32) {
    %c0_i32 = arith.constant 0 : i32
    %c0_i32_0 = arith.constant 0 : i32
    %c0_i32_1 = arith.constant 0 : i32
    return %c0_i32, %c0_i32_0 : i32, i32
  }
  func.func @transform_3(%arg0: i32, %arg1: i32) -> (i32, i32) {
    %c0_i32 = arith.constant 0 : i32
    %c0_i32_0 = arith.constant 0 : i32
    return %c0_i32, %arg0 : i32, i32
  }
  func.func @transform_4(%arg0: i32, %arg1: i32) -> (i32, i32) {
    %c0_i32 = arith.constant 0 : i32
    %c0_i32_0 = arith.constant 0 : i32
    return %c0_i32, %arg0 : i32, i32
  }
  func.func @transform_5(%arg0: i32, %arg1: i32) -> (i32, i32, i32) {
    %c0_i32 = arith.constant 0 : i32
    %c0_i32_0 = arith.constant 0 : i32
    return %arg1, %c0_i32, %arg0 : i32, i32, i32
  }
}

</mosaic_0001>

<bundles_post_ra>
// kernel: _forward_impl.1
= control target key start
LH: loop header
LB: loop body
LE: loop exit
PB: predicated region body
PF: predicated region fallthrough
CT: control target
= control target key end

     0   :  { %s986_s18 = smov 0   ;;  %s988_s19 = smov 0   ;;  %s1078_s0 = inlined_call_operand.vmem [shape: f32[2,12,24], index: 0, kind: input, shape index: {}]   ;;  %s1079_s1 = inlined_call_operand.vmem [shape: f32[3,12,12], index: 1, kind: input, shape index: {}]   ;;  %s1080_s2 = inlined_call_operand.vmem [shape: f32[24,8], index: 2, kind: input, shape index: {}]   ;;  %s1081_s3 = inlined_call_operand.vmem [shape: f32[12,8], index: 3, kind: input, shape index: {}]   ;;  %s1082_s4 = inlined_call_operand.vmem [shape: f32[12,8], index: 4, kind: input, shape index: {}]   ;;  %s1083_s5 = inlined_call_operand.vmem [shape: f32[2,12,8], index: 5, kind: output, shape index: {}]  }
   0x1   :  { %s990_s20 = smov 0  }
   0x2 LB: > { %s24_s21 = sadd.s32 1, %s950_s19  ;;  %p806_p0 = scmp.ge.s32.totalorder %s954_s20, 1  ;;  %s954_s20 = sphi %s990_s20, %s15_s20   ;;  %s950_s19 = sphi %s988_s19, %s1085_s19   ;;  %s946_s18 = sphi %s986_s18, %s1084_s18  }
   0x3   : > { %p25_p1 = scmp.ge.s32.totalorder %s24_s21, 2  ;;  %p224_p2 = scmp.lt.s32.totalorder %s954_s20, 3 }
   0x5   : > { %s1087_s21 = smov (%p25_p1, %s24_s21), 0  ;;  %p225_p3 = pnand %p806_p0, %p224_p2 }
   0x6   : > { %v290_v0 = vlaneseq (!%p225_p3)  ;;  %v322_v1 = vld [vmem:[%s1079_s1] sm:$0xff] (!%p225_p3)  ;;  %vm332_vm0 = vcmask (!%p225_p3), 97280   ;;  %p266_p4 = scmp.lt.s32.totalorder (!%p225_p3), %s946_s18, 1  ;;  %v811_v2 = vld [vmem:[%s1079_s1 + $0x10] sm:$0xff] (!%p225_p3)  ;;  %vm339_vm4 = vcmask (!%p225_p3), 1043456   ;;  %v309_v14 = vld [vmem:[%s1080_s2 + $0x8] sm:$0xff] (!%p225_p3) }
   0x7   : > { %228 = sbr.rel (%p225_p3) target bundleno = 471 (0x1d7), region = 40  ;;  %861 = vmatprep.mubr.msk.f32.mxu0 (!%p225_p3), %vm332_vm0, %v322_v1  ;;  %854 = vmatprep.mubr.msk.f32.mxu1 (!%p225_p3), %vm332_vm0, %v811_v2  ;;  %v308_v13 = vld [vmem:[%s1080_s2] sm:$0xff] (!%p225_p3)  ;;  %v323_v22 = vld [vmem:[%s1079_s1 + $0x8] sm:$0xf] (!%p225_p3)  ;;  %v812_v23 = vld [vmem:[%s1079_s1 + $0x18] sm:$0xf] (!%p225_p3) }
   0x8   : > { %v291_v3 = vand.u32 (!%p225_p3), 127, %v290_v0  ;;  %v898_v21 = vpack.c.bf16 (!%p225_p3), %v309_v14, %v308_v13  ;;  %v821_v24 = vld [vmem:[%s1079_s1 + $0x20] sm:$0xff] (!%p225_p3)  ;;  %v822_v25 = vld [vmem:[%s1079_s1 + $0x28] sm:$0xf] (!%p225_p3)  ;;  %v310_v26 = vld [vmem:[%s1080_s2 + $0x10] sm:$0xff] (!%p225_p3)  ;;  %vm596_vm11 = vcmask (!%p225_p3), 195584  }
   0x9   : > { %v312_v33 = vld [vmem:[%s1081_s3 + $0x8] sm:$0xf] (!%p225_p3)  ;;  %v311_v34 = vld [vmem:[%s1081_s3] sm:$0xff] (!%p225_p3)  ;;  %vm684_vm12 = vcmask (!%p225_p3), 60416   ;;  %vm682_vm13 = vcmask (!%p225_p3), 64512  }
   0xa   : > { %v1012_v4 = vmul.u32.u64.low (!%p225_p3), 2863311531, %v291_v3  ;;  %v1013_v5 = vmul.u32.u64.high 2863311531, %v291_v3, %v1012_v4  ;;  %v314_v35 = vld [vmem:[%s1082_s4 + $0x8] sm:$0xf] (!%p225_p3)  ;;  %v313_v38 = vld [vmem:[%s1082_s4] sm:$0xff] (!%p225_p3) }
   0xc   : > { %v298_v6 = vshrl.u32 (!%p225_p3), %v1013_v5, 1 }
   0xe   : > { %s1089_s18 = smov (!%p266_p4, %s946_s18), 1  ;;  %v299_v7 = vmul.u32 3, %v298_v6 }
   0xf   : > { %s831_s26 = sshll.u32 %s1089_s18, 4 }
  0x10   : > { %s273_s29 = scalar_lea.vmem %s1078_s0, %s831_s26  ;;  %v300_v8 = vsub.s32 %v291_v3, %v299_v7  ;;  %s289_s9 = scalar_lea.vmem %s1083_s5, %s831_s26 }
  0x11   : > { %v316_v10 = vld [vmem:[%s273_s29 + $0x8] sm:$0xf]  ;;  %v315_v12 = vld [vmem:[%s273_s29] sm:$0xff] }
  0x12   : > { %vm303_vm1 = vcmp.ne.s32.totalorder %v300_v8, 0  ;;  %vm304_vm2 = vcmp.lt.s32.totalorder %v300_v8, 0  ;;  %v306_v9 = vadd.s32 3, %v300_v8 }
  0x13   : > { %vm305_vm3 = vmand %vm304_vm2, %vm303_vm1 }
  0x14   : > { %v307_v11 = vsel %vm305_vm3, %v306_v9, %v300_v8 }
  0x15   : > { %vm317_vm5 = vcmp.eq.s32.totalorder %v307_v11, 0  ;;  %vm502_vm6 = vcmp.eq.s32.totalorder %v307_v11, 2  ;;  %vm324_vm7 = vcmp.eq.s32.totalorder %v307_v11, 1 }
  0x16   : > { %v321_v15 = vsel %vm317_vm5, %v316_v10, 0.0  ;;  %vm887_vm8 = vmpackc.low %vm339_vm4, %vm317_vm5  ;;  %v506_v16 = vsel %vm502_vm6, %v316_v10, 0.0  ;;  %v328_v17 = vsel %vm324_vm7, %v316_v10, 0.0 }
  0x17   : > { %v886_v18 = vpack.c.bf16 %v321_v15, %v315_v12  ;;  %v892_v19 = vpack.c.bf16 %v506_v16, %v315_v12  ;;  %vm893_vm9 = vmpackc.low %vm339_vm4, %vm502_vm6  ;;  %v880_v20 = vpack.c.bf16 %v328_v17, %v315_v12 }
  0x18   : > { %vm881_vm10 = vmpackc.low %vm339_vm4, %vm324_vm7 }
  0x19   : > { %888 = vmatprep.subr.msk.bf16.mxu0 %vm887_vm8, %v886_v18  ;;  %882 = vmatprep.subr.msk.bf16.mxu1 %vm881_vm10, %v880_v20 }
  0x1a   : > { %891 = vmatpush3.bf16.msk.msra.mxu0 %vm887_vm8, %v886_v18  ;;  %885 = vmatpush3.bf16.msk.msra.mxu1 %vm881_vm10, %v880_v20 }
  0x1b   : > { %894 = vmatprep.subr.msk.bf16.mxu0 %vm893_vm9, %v892_v19  ;;  %899 = vmatprep.subr.bf16.mxu1 %v898_v21 }
  0x1d   : > { %862 = vmatmul.mubr.msk.f32.vlgmr.msra.gmra.mrb[0].mxu0 %vm332_vm0, %v323_v22  ;;  %855 = vmatmul.mubr.msk.f32.vlgmr.msra.gmra.mrb[0].mxu1 %vm332_vm0, %v812_v23 }
  0x1e   : > { %897 = vmatpush3.bf16.msk.msra.mxu0 %vm893_vm9, %v892_v19  ;;  %868 = vmatprep.mubr.msk.f32.mxu0 %vm332_vm0, %v821_v24 }
  0x1f   : > { %901 = vmatpush3.bf16.msra.mxu1 %v898_v21 }
  0x20   : > { %875 = vmatprep.subr.mxu1 %v310_v26 }
  0x23   : > { %876 = vmatpush3.msra.mxu1 %v310_v26 }
  0x25   : > { %869 = vmatmul.mubr.msk.f32.vlgmr.msra.gmra.mrb[0].mxu0 %vm332_vm0, %v822_v25 }
  0xf0   : > { %v856_v27 = vpop.f32.mrb[0].mxu1 }
  0xf1   : > { %v409_v28 = vpop.f32.mrb[1].mxu1 }
  0xf8   : > { %v870_v29 = vpop.f32.mrb[0].mxu0 }
  0xf9   : > { %v902_v30 = vadd.f32 %v870_v29, %v856_v27  ;;  %v585_v31 = vpop.f32.mrb[1].mxu0 }
  0xfa   : > { %v903_v32 = vadd.f32 %v585_v31, %v409_v28 }
  0xfc   : > { %877 = vmatprep.mubr.msk.f32.mxu1 %vm596_vm11, %v903_v32 }
  0xfd   : > { %878 = vmatmul.mubr.msk.f32.vlgmr.msra.gmra.mrb[2].mxu1 %vm596_vm11, %v902_v30 }
 0x1d0   : > { %v879_v36 = vpop.f32.mrb[2].mxu1 }
 0x1d1   : > { %v679_v37 = vmul.f32 %v879_v36, %v312_v33  ;;  %v669_v39 = vpop.f32.mrb[3].mxu1 }
 0x1d2   : > { %v678_v40 = vmul.f32 %v669_v39, %v311_v34 }
 0x1d3   : > { %v681_v41 = vadd.f32 %v679_v37, %v314_v35 }
 0x1d4   : > { %v680_v42 = vadd.f32 %v678_v40, %v313_v38 }
 0x1d5   : > { %685 = vst.msk [vmem:[%s289_s9 + $0x8] sm:$0xf] %vm684_vm12, %v681_v41 }
 0x1d6   : > { %683 = vst.msk [vmem:[%s289_s9] sm:$0xff] %vm682_vm13, %v680_v42 }
 0x1d7 PF: > { %s15_s20 = sadd.s32 1, %s954_s20   ;;  %s1084_s18 = smov %s950_s19 }
 0x1d8   : > { %p12_p5 = scmp.ge.s32.totalorder %s15_s20, 4   ;;  %s1085_s19 = smov %s1087_s21 }
 0x1da   :  { %14 = sbr.rel (!%p12_p5) target bundleno = 2 (0x2), region = 78 }

</bundles_post_ra>
